<compile_context>
chip_gen: v7x
topology: tpu7x:2x2x1
jax: 0.10.0
libtpu: 0.0.40
codegen_flags: <defaults>
</compile_context>

<pallas_src>
import functools
import math

import jax
import jax.numpy as jnp
from jax.experimental import pallas as pl
from jax.experimental.pallas import tpu as pltpu


def _round_up(x, m):
    return ((x + m - 1) // m) * m


# --------------------------------------------------------------------------
# Pallas kernel: fused windowed-DFT power spectrum + mel projection
# --------------------------------------------------------------------------
def mel_power_kernel(frames_ref, basis_ref, fb_ref, out_ref, *, pad_f):
    # frames_ref : (TM, n_fft)       raw frames (window folded into basis)
    # basis_ref  : (n_fft, 2*pad_f)  [w*cos | zeros | -w*sin | zeros]
    # fb_ref     : (pad_f, pad_m)    column-flipped, zero-padded mel filterbank
    # out_ref    : (TM, pad_m)       lane-dense power-mel output (frames-major)
    spec = jnp.dot(frames_ref[...], basis_ref[...],
                   preferred_element_type=jnp.float32)        # single MXU pass, 2*pad_f lanes
    re = spec[:, :pad_f]                                      # vreg-aligned lane split
    im = spec[:, pad_f:]
    power = re * re + im * im                                 # |X|^2 (VPU)
    out_ref[...] = jnp.dot(power, fb_ref[...],
                           preferred_element_type=jnp.float32)  # MXU mel projection


# --------------------------------------------------------------------------
# Host-side parameter construction (matches torchaudio defaults)
# --------------------------------------------------------------------------
def _hz_to_mel_htk(f):
    return 2595.0 * jnp.log10(1.0 + f / 700.0)


def _mel_to_hz_htk(m):
    return 700.0 * (10.0 ** (m / 2595.0) - 1.0)


def melscale_fbanks(n_freqs, f_min, f_max, n_mels, sample_rate):
    """torchaudio.functional.melscale_fbanks, norm='slaney', mel_scale='htk'."""
    all_freqs = jnp.linspace(0.0, sample_rate // 2, n_freqs)
    m_min = _hz_to_mel_htk(jnp.asarray(f_min, jnp.float32))
    m_max = _hz_to_mel_htk(jnp.asarray(f_max, jnp.float32))
    m_pts = jnp.linspace(m_min, m_max, n_mels + 2)
    f_pts = _mel_to_hz_htk(m_pts)

    f_diff = f_pts[1:] - f_pts[:-1]                              # (n_mels + 1,)
    slopes = f_pts[None, :] - all_freqs[:, None]                 # (n_freqs, n_mels + 2)
    down_slopes = (-1.0 * slopes[:, :-2]) / f_diff[:-1]
    up_slopes = slopes[:, 2:] / f_diff[1:]
    fb = jnp.maximum(0.0, jnp.minimum(down_slopes, up_slopes))   # (n_freqs, n_mels)

    # Slaney normalization
    enorm = 2.0 / (f_pts[2:n_mels + 2] - f_pts[:n_mels])
    fb = fb * enorm[None, :]
    return fb.astype(jnp.float32)


def hann_window_padded(win_length, n_fft):
    """torch.hann_window(win_length, periodic=True), center-padded to n_fft."""
    n = jnp.arange(win_length, dtype=jnp.float32)
    w = 0.5 - 0.5 * jnp.cos(2.0 * jnp.pi * n / win_length)
    if win_length < n_fft:
        lpad = (n_fft - win_length) // 2
        rpad = n_fft - win_length - lpad
        w = jnp.pad(w, (lpad, rpad))
    return w


# --------------------------------------------------------------------------
# Wrapper
# --------------------------------------------------------------------------
def spectrogram_power_mel(x, *, sampling_rate=22000, n_fft=128, win_length=None,
                          hop_length=None, n_mels=32, fmin=0.0, fmax=None,
                          tile_frames=2048):
    """Forward pass of Spectrogram(representation='power_mel', mode='raw')."""
    x = jnp.asarray(x, jnp.float32)
    assert x.ndim == 1, "this implementation handles a 1-D waveform input"
    win_length = n_fft if win_length is None else win_length
    hop_length = win_length // 4 if hop_length is None else hop_length
    fmax = sampling_rate / 2.0 if fmax is None else fmax

    n_freqs = n_fft // 2 + 1
    pad_f = _round_up(n_freqs, 128)       # lane-padded frequency axis
    pad_m = _round_up(n_mels, 128)        # lane-padded mel axis (unmasked stores)
    pad = n_fft // 2

    # center=True, reflect padding (torch.stft default pad_mode)
    x_pad = jnp.pad(x, (pad, pad), mode="reflect")
    n_frames = 1 + (x_pad.shape[0] - n_fft) // hop_length

    # framing (gather glue — stays in plain JAX)
    # TODO(synk): for very long audio, build frames in-kernel from a waveform
    # strip to avoid the n_fft/hop (4x) HBM duplication of this gather.
    idx = (jnp.arange(n_frames)[:, None] * hop_length
           + jnp.arange(n_fft)[None, :])
    frames = x_pad[idx]                                          # (T, n_fft)

    # ---- constant "parameters": window-folded DFT bases + mel filterbank ----
    window = hann_window_padded(win_length, n_fft)               # (n_fft,)
    n = jnp.arange(n_fft, dtype=jnp.float32)[:, None]
    k = jnp.arange(n_freqs, dtype=jnp.float32)[None, :]
    ang = 2.0 * jnp.pi * n * k / float(n_fft)
    cos_w = window[:, None] * jnp.cos(ang)                       # (n_fft, n_freqs)
    sin_w = window[:, None] * (-jnp.sin(ang))                    # correct DFT sign

    basis = jnp.zeros((n_fft, 2 * pad_f), jnp.float32)
    basis = basis.at[:, :n_freqs].set(cos_w)
    basis = basis.at[:, pad_f:pad_f + n_freqs].set(sin_w)

    fb = melscale_fbanks(n_freqs, fmin, fmax, n_mels, sampling_rate)  # (n_freqs, n_mels)
    fb = fb[:, ::-1]                                             # absorb np.flipud
    fb_pad = jnp.zeros((pad_f, pad_m), jnp.float32)
    fb_pad = fb_pad.at[:n_freqs, :n_mels].set(fb)

    # ---- frames grid: pipelined, VMEM-bounded, megacore-shardable ----
    tm = min(tile_frames, _round_up(n_frames, 8))
    t_pad = _round_up(n_frames, tm)
    if t_pad > n_frames:
        frames = jnp.pad(frames, ((0, t_pad - n_frames), (0, 0)))
    num_tiles = t_pad // tm

    kernel = functools.partial(mel_power_kernel, pad_f=pad_f)
    mel_tf = pl.pallas_call(
        kernel,
        out_shape=jax.ShapeDtypeStruct((t_pad, pad_m), jnp.float32),
        grid=(num_tiles,),
        in_specs=[
            pl.BlockSpec((tm, n_fft), lambda i: (i, 0)),         # frame tiles (pipelined)
            pl.BlockSpec((n_fft, 2 * pad_f), lambda i: (0, 0)),  # constant basis
            pl.BlockSpec((pad_f, pad_m), lambda i: (0, 0)),      # constant filterbank
        ],
        out_specs=pl.BlockSpec((tm, pad_m), lambda i: (i, 0)),
        compiler_params=pltpu.CompilerParams(
            dimension_semantics=("parallel",)),
    )(frames, basis, fb_pad)                                     # (t_pad, pad_m)

    # slice away padding; format_representation (mode='raw', 2-D spectrogram):
    # flipud already folded into fb -> only transpose + expand_dims remain.
    mel = mel_tf[:n_frames, :n_mels].T                           # (n_mels, T), already flipped
    mel = mel[None, ...]                                         # (1, n_mels, T)
    return mel

    # TODO(synk): stft/cqt/cwt/mfcc branches, convert_to_db, and the PIL
    # 'grayscale'/'rgb' representation modes are not implemented here.


if __name__ == "__main__":
    key = jax.random.PRNGKey(0)
    # small waveform consistent with the module's forward (1-D audio signal)
    x = jax.random.normal(key, (512,), dtype=jnp.float32)

    out = spectrogram_power_mel(
        x, sampling_rate=22000, n_fft=128, hop_length=32, n_mels=32)
    out = jax.block_until_ready(out)

    assert out.shape == (1, 32, 1 + 512 // 32), out.shape
    assert out.dtype == jnp.float32
    assert bool(jnp.all(jnp.isfinite(out)))
    print("KERNEL_OK")
</pallas_src>

<mosaic_0001>
module attributes {stable_mosaic.version = 11 : i64} {
  func.func @mel_power_kernel(%arg0: i32, %arg1: memref<24x128xf32, #tpu.memory_space<vmem>>, %arg2: memref<128x256xf32, #tpu.memory_space<vmem>>, %arg3: memref<128x128xf32, #tpu.memory_space<vmem>>, %arg4: memref<24x128xf32, #tpu.memory_space<vmem>>) attributes {dimension_semantics = [#tpu.dimension_semantics<parallel>], iteration_bounds = array<i64: 1>, scalar_prefetch = 0 : i64, scratch_operands = 0 : i64, tpu.core_type = #tpu.core_type<tc>, window_params = [{transform_indices = @transform_0, window_bounds = array<i64: 24, 128>}, {pipeline_mode = #tpu.pipeline_mode<synchronous>, transform_indices = @transform_1, window_bounds = array<i64: 128, 256>}, {pipeline_mode = #tpu.pipeline_mode<synchronous>, transform_indices = @transform_2, window_bounds = array<i64: 128, 128>}, {transform_indices = @transform_3, window_bounds = array<i64: 24, 128>}]} {
    %c0 = arith.constant 0 : index
    %c0_0 = arith.constant 0 : index
    %0 = vector.load %arg1[%c0, %c0_0] : memref<24x128xf32, #tpu.memory_space<vmem>>, vector<24x128xf32>
    %c0_1 = arith.constant 0 : index
    %c0_2 = arith.constant 0 : index
    %1 = vector.load %arg2[%c0_1, %c0_2] : memref<128x256xf32, #tpu.memory_space<vmem>>, vector<128x256xf32>
    %cst = arith.constant dense<0.000000e+00> : vector<24x256xf32>
    %2 = tpu.matmul %0, %1, %cst {dimension_numbers = #tpu.dot_dimension_numbers<[1], [0], [0], [1], [0, 0, 1, 1], [], []>} : vector<24x128xf32>, vector<128x256xf32>, vector<24x256xf32> -> vector<24x256xf32>
    %3 = vector.extract_strided_slice %2 {offsets = [0, 0], sizes = [24, 128], strides = [1, 1]} : vector<24x256xf32> to vector<24x128xf32>
    %4 = vector.extract_strided_slice %2 {offsets = [0, 128], sizes = [24, 128], strides = [1, 1]} : vector<24x256xf32> to vector<24x128xf32>
    %5 = arith.mulf %3, %3 : vector<24x128xf32>
    %6 = arith.mulf %4, %4 : vector<24x128xf32>
    %7 = arith.addf %5, %6 : vector<24x128xf32>
    %c0_3 = arith.constant 0 : index
    %c0_4 = arith.constant 0 : index
    %8 = vector.load %arg3[%c0_3, %c0_4] : memref<128x128xf32, #tpu.memory_space<vmem>>, vector<128x128xf32>
    %cst_5 = arith.constant dense<0.000000e+00> : vector<24x128xf32>
    %9 = tpu.matmul %7, %8, %cst_5 {dimension_numbers = #tpu.dot_dimension_numbers<[1], [0], [0], [1], [0, 0, 1, 1], [], []>} : vector<24x128xf32>, vector<128x128xf32>, vector<24x128xf32> -> vector<24x128xf32>
    %c0_6 = arith.constant 0 : index
    %c0_7 = arith.constant 0 : index
    %10 = vector.load %arg4[%c0_6, %c0_7] : memref<24x128xf32, #tpu.memory_space<vmem>>, vector<24x128xf32>
    tpu.vector_store %arg4[%c0_6, %c0_7], %9 {strides = array<i32>} : memref<24x128xf32, #tpu.memory_space<vmem>>, vector<24x128xf32>,
    return
  }
  func.func @transform_0(%arg0: i32) -> (i32, i32) {
    %c0_i32 = arith.constant 0 : i32
    %c0_i32_0 = arith.constant 0 : i32
    return %arg0, %c0_i32 : i32, i32
  }
  func.func @transform_1(%arg0: i32) -> (i32, i32) {
    %c0_i32 = arith.constant 0 : i32
    %c0_i32_0 = arith.constant 0 : i32
    %c0_i32_1 = arith.constant 0 : i32
    return %c0_i32, %c0_i32_0 : i32, i32
  }
  func.func @transform_2(%arg0: i32) -> (i32, i32) {
    %c0_i32 = arith.constant 0 : i32
    %c0_i32_0 = arith.constant 0 : i32
    %c0_i32_1 = arith.constant 0 : i32
    return %c0_i32, %c0_i32_0 : i32, i32
  }
  func.func @transform_3(%arg0: i32) -> (i32, i32) {
    %c0_i32 = arith.constant 0 : i32
    %c0_i32_0 = arith.constant 0 : i32
    return %arg0, %c0_i32 : i32, i32
  }
}

</mosaic_0001>

<bundles_post_ra>
// kernel: tpu_custom_call.1
= control target key start
LH: loop header
LB: loop body
LE: loop exit
PB: predicated region body
PF: predicated region fallthrough
CT: control target
= control target key end

     0   :  { %8 = vsyncpa [#allocation3], 0  ;;  %s626_s0 = inlined_call_operand.hbm [shape: f32[24,128], index: 0, kind: input, shape index: {}]   ;;  %s627_s1 = inlined_call_operand.hbm [shape: f32[128,256], index: 1, kind: input, shape index: {}]   ;;  %s628_s2 = inlined_call_operand.hbm [shape: f32[128,128], index: 2, kind: input, shape index: {}]   ;;  %s629_s3 = inlined_call_operand.hbm [shape: f32[24,128], index: 3, kind: output, shape index: {}]  }
   0x1   :  { %9 = vsyncpa [#allocation6], 0 }
   0x2   :  { %10 = vsyncpa [#allocation4], 0  ;;  %s521_s12 = smov [#allocation5]   ;;  %s427_s16 = scalar_lea.hbm %s627_s1, 4096 }
   0x3   :  { %s28_s13 = sshll.u32 %s521_s12, 4  ;;  %p428_p0 = scmp.ne.s32.totalorder %s627_s1, %s427_s16  ;;  %s29_s13 = int_to_ptr.vmem [resolvable:$true] %s28_s13 }
   0x4   :  { %p431_p1 = scmp.lt.u32.totalorder %s427_s16, %s627_s1 }
   0x6   :  { %p433_p2 = pnand %p431_p1, %p428_p0 }
   0x8   :  { %436 = shalt.err (!%p433_p2)
}
   0x9   :  { %s437_s21 = scalar_lea.vmem %s29_s13, 4096  ;;  %p442_p4 = scmp.lt.s32.totalorder %s29_s13, %s29_s13 }
   0xa   :  { %p438_p3 = scmp.ne.s32.totalorder %s29_s13, %s437_s21  ;;  %p443_p5 = scmp.lt.s32.totalorder %s437_s21, %s437_s21 }
   0xc   :  { %p444_p6 = por %p443_p5, %p442_p4 }
   0xe   :  { %p445_p7 = pnand %p444_p6, %p438_p3 }
  0x10   :  { %448 = shalt.err (!%p445_p7)
}
  0x11   :  { %s522_s22 = smov 256   ;;  %s523_s23 = smov 16  }
  0x12   :  { %34 = dma.hbm_to_vmem [thread:$0]  %s627_s1, 4096, %s29_s13, [#allocation6], %s522_s22, %s522_s22, %s523_s23  }
  0x13   :  { %s524_s26 = smov [#allocation2]   ;;  %s449_s30 = scalar_lea.hbm %s626_s0, 384 }
  0x14   :  { %s16_s27 = sshll.u32 %s524_s26, 4  ;;  %p450_p8 = scmp.ne.s32.totalorder %s626_s0, %s449_s30  ;;  %s17_s27 = int_to_ptr.vmem [resolvable:$true] %s16_s27 }
  0x15   :  { %p453_p9 = scmp.lt.u32.totalorder %s449_s30, %s626_s0 }
  0x17   :  { %p455_p10 = pnand %p453_p9, %p450_p8 }
  0x19   :  { %458 = shalt.err (!%p455_p10)
}
  0x1a   :  { %s459_s8 = scalar_lea.vmem %s17_s27, 384  ;;  %p464_p12 = scmp.lt.s32.totalorder %s17_s27, %s17_s27 }
  0x1b   :  { %p460_p11 = scmp.ne.s32.totalorder %s17_s27, %s459_s8  ;;  %p465_p13 = scmp.lt.s32.totalorder %s459_s8, %s459_s8 }
  0x1d   :  { %p466_p0 = por %p465_p13, %p464_p12 }
  0x1f   :  { %p467_p1 = pnand %p466_p0, %p460_p11 }
  0x21   :  { %470 = shalt.err (!%p467_p1)
}
  0x22   :  { %s525_s1 = smov 128   ;;  %s526_s9 = smov 8  }
  0x23   :  { %22 = dma.hbm_to_vmem [thread:$0]  %s626_s0, 384, %s17_s27, [#allocation3], %s525_s1, %s525_s1, %s526_s9  }
  0x24   :  { %s527_s12 = smov [#allocation7]   ;;  %s471_s16 = scalar_lea.hbm %s628_s2, 2048 }
  0x25   :  { %s40_s13 = sshll.u32 %s527_s12, 4  ;;  %p472_p2 = scmp.ne.s32.totalorder %s628_s2, %s471_s16  ;;  %s41_s13 = int_to_ptr.vmem [resolvable:$true] %s40_s13 }
  0x26   :  { %p475_p3 = scmp.lt.u32.totalorder %s471_s16, %s628_s2 }
  0x28   :  { %p477_p4 = pnand %p475_p3, %p472_p2 }
  0x2a   :  { %480 = shalt.err (!%p477_p4)
}
  0x2b   :  { %s481_s21 = scalar_lea.vmem %s41_s13, 2048  ;;  %p486_p6 = scmp.lt.s32.totalorder %s41_s13, %s41_s13 }
  0x2c   :  { %p482_p5 = scmp.ne.s32.totalorder %s41_s13, %s481_s21  ;;  %p487_p7 = scmp.lt.s32.totalorder %s481_s21, %s481_s21 }
  0x2e   :  { %p488_p8 = por %p487_p7, %p486_p6 }
  0x30   :  { %p489_p9 = pnand %p488_p8, %p482_p5 }
  0x32   :  { %492 = shalt.err (!%p489_p9)
}
  0x33   :  { %46 = dma.hbm_to_vmem [thread:$0]  %s628_s2, 2048, %s41_s13, [#allocation6], %s525_s1, %s525_s1, %s526_s9  }
  0x34   :  { %515 = dma.done.wait [#allocation3], 384  }
  0x35   :  { %516 = vsyncadd [#allocation3], 4294966912 }
  0x36   :  { %517 = dma.done.wait [#allocation6], 6144  }
  0x37   :  { %518 = vsyncadd [#allocation6], 4294961152  ;;  %v528_v0 = vmov 0.0   ;;  %v529_v1 = vmov 0.0|0.0   ;;  %v60_v2 = vld [vmem:[#allocation5 + $0x8] sm:$0xff]  ;;  %v62_v3 = vld [vmem:[#allocation5 + $0x18] sm:$0xff] }
  0x38   :  { %155 = vmatprep.mubr.f32.mxu0 %v528_v0  ;;  %392 = vmatprep.subr.bf16.mxu1 %v529_v1  ;;  %v59_v4 = vld [vmem:[#allocation5] sm:$0xff]  ;;  %v360_v5 = vpack.c.bf16 %v62_v3, %v60_v2  ;;  %v61_v6 = vld [vmem:[#allocation5 + $0x10] sm:$0xff]  ;;  %v64_v7 = vld [vmem:[#allocation5 + $0x28] sm:$0xff]  ;;  %vm530_vm0 = vmmov 0   ;;  %s531_s2 = smov [#allocation8]  }
  0x39   :  { %v66_v8 = vld [vmem:[#allocation5 + $0x38] sm:$0xff]  ;;  %v362_v9 = vpack.c.bf16 %v61_v6, %v59_v4  ;;  %v63_v11 = vld [vmem:[#allocation5 + $0x20] sm:$0xff]  ;;  %v65_v12 = vld [vmem:[#allocation5 + $0x30] sm:$0xff]  ;;  %351 = vmatprep.mubr.msk.f32.mxu1 %vm530_vm0, %v528_v0  ;;  %s287_s23 = sshll.u32 %s531_s2, 4  ;;  %s288_s23 = int_to_ptr.vmem [resolvable:$true] %s287_s23 }
  0x3a   :  { %v364_v10 = vpack.c.bf16 %v66_v8, %v64_v7  ;;  %v68_v13 = vld [vmem:[#allocation5 + $0x48] sm:$0xff]  ;;  %361 = vmatprep.subr.bf16.mxu0 %v360_v5  ;;  %v70_v14 = vld [vmem:[#allocation5 + $0x58] sm:$0xff]  ;;  %v366_v15 = vpack.c.bf16 %v65_v12, %v63_v11  ;;  %v67_v17 = vld [vmem:[#allocation5 + $0x40] sm:$0xff]  ;;  %s493_s24 = scalar_lea.vmem %s288_s23, 384  ;;  %p498_p11 = scmp.lt.s32.totalorder %s288_s23, %s288_s23 }
  0x3b   :  { %363 = vmatpush1.bf16.msra.mxu0 %v362_v9  ;;  %v368_v16 = vpack.c.bf16 %v70_v14, %v68_v13  ;;  %v69_v18 = vld [vmem:[#allocation5 + $0x50] sm:$0xff]  ;;  %v72_v19 = vld [vmem:[#allocation5 + $0x68] sm:$0xff]  ;;  %v74_v20 = vld [vmem:[#allocation5 + $0x78] sm:$0xff]  ;;  %p494_p10 = scmp.ne.s32.totalorder %s288_s23, %s493_s24  ;;  %p499_p12 = scmp.lt.s32.totalorder %s493_s24, %s493_s24 }
  0x3c   :  { %365 = vmatprep.subr.bf16.mxu0 %v364_v10  ;;  %v370_v21 = vpack.c.bf16 %v69_v18, %v67_v17  ;;  %v372_v22 = vpack.c.bf16 %v74_v20, %v72_v19  ;;  %v71_v23 = vld [vmem:[#allocation5 + $0x60] sm:$0xff]  ;;  %v73_v24 = vld [vmem:[#allocation5 + $0x70] sm:$0xff]  ;;  %v76_v25 = vld [vmem:[#allocation5 + $0x88] sm:$0xff] }
  0x3d   :  { %v78_v26 = vld [vmem:[#allocation5 + $0x98] sm:$0xff]  ;;  %v183_v27 = vld [vmem:[#allocation7] sm:$0xff]  ;;  %v374_v28 = vpack.c.bf16 %v73_v24, %v71_v23  ;;  %v184_v29 = vld [vmem:[#allocation7 + $0x8] sm:$0xff]  ;;  %p500_p13 = por %p499_p12, %p498_p11 }
  0x3e   :  { %v185_v30 = vld [vmem:[#allocation7 + $0x10] sm:$0xff]  ;;  %v186_v31 = vld [vmem:[#allocation7 + $0x18] sm:$0xff]  ;;  %v376_v32 = vpack.c.bf16 %v78_v26, %v76_v25  ;;  %v75_v33 = vld [vmem:[#allocation5 + $0x80] sm:$0xff]  ;;  %v393_v35 = vpack.c.bf16 %v184_v29, %v183_v27 }
  0x3f   :  { %367 = vmatpush1.bf16.msra.mxu0 %v366_v15  ;;  %v77_v34 = vld [vmem:[#allocation5 + $0x90] sm:$0xff]  ;;  %v80_v36 = vld [vmem:[#allocation5 + $0xa8] sm:$0xff]  ;;  %v82_v37 = vld [vmem:[#allocation5 + $0xb8] sm:$0xff]  ;;  %v396_v38 = vpack.c.bf16 %v186_v31, %v185_v30  ;;  %p501_p0 = pnand %p500_p13, %p494_p10 }
  0x40   :  { %369 = vmatprep.subr.bf16.mxu0 %v368_v16  ;;  %394 = vmatpush3.bf16.msra.mxu1 %v393_v35  ;;  %v378_v39 = vpack.c.bf16 %v77_v34, %v75_v33  ;;  %v187_v40 = vld [vmem:[#allocation7 + $0x20] sm:$0xff]  ;;  %v188_v41 = vld [vmem:[#allocation7 + $0x28] sm:$0xff]  ;;  %v380_v42 = vpack.c.bf16 %v82_v37, %v80_v36  ;;  %v81_v44 = vld [vmem:[#allocation5 + $0xb0] sm:$0xff] }
  0x41   :  { %395 = vmatprep.subr.bf16.mxu1 %v529_v1  ;;  %v79_v43 = vld [vmem:[#allocation5 + $0xa0] sm:$0xff]  ;;  %v84_v45 = vld [vmem:[#allocation5 + $0xc8] sm:$0xff]  ;;  %v86_v46 = vld [vmem:[#allocation5 + $0xd8] sm:$0xff]  ;;  %v399_v47 = vpack.c.bf16 %v188_v41, %v187_v40 }
  0x42   :  { %v382_v48 = vpack.c.bf16 %v81_v44, %v79_v43  ;;  %v189_v49 = vld [vmem:[#allocation7 + $0x30] sm:$0xff]  ;;  %v190_v50 = vld [vmem:[#allocation7 + $0x38] sm:$0xff]  ;;  %v384_v51 = vpack.c.bf16 %v86_v46, %v84_v45  ;;  %v83_v52 = vld [vmem:[#allocation5 + $0xc0] sm:$0xff] }
  0x43   :  { %371 = vmatpush1.bf16.msra.mxu0 %v370_v21  ;;  %v85_v53 = vld [vmem:[#allocation5 + $0xd0] sm:$0xff]  ;;  %v88_v54 = vld [vmem:[#allocation5 + $0xe8] sm:$0xff]  ;;  %v90_v55 = vld [vmem:[#allocation5 + $0xf8] sm:$0xff]  ;;  %v402_v56 = vpack.c.bf16 %v190_v50, %v189_v49 }
  0x44   :  { %373 = vmatprep.subr.bf16.mxu0 %v372_v22  ;;  %397 = vmatpush3.bf16.msra.mxu1 %v396_v38  ;;  %v386_v57 = vpack.c.bf16 %v85_v53, %v83_v52  ;;  %v191_v58 = vld [vmem:[#allocation7 + $0x40] sm:$0xff]  ;;  %v192_v59 = vld [vmem:[#allocation7 + $0x48] sm:$0xff]  ;;  %v388_v60 = vpack.c.bf16 %v90_v55, %v88_v54  ;;  %v89_v62 = vld [vmem:[#allocation5 + $0xf0] sm:$0xff] }
  0x45   :  { %398 = vmatprep.subr.bf16.mxu1 %v529_v1  ;;  %v87_v61 = vld [vmem:[#allocation5 + $0xe0] sm:$0xff]  ;;  %v405_v63 = vpack.c.bf16 %v192_v59, %v191_v58  ;;  %v193_v3 = vld [vmem:[#allocation7 + $0x50] sm:$0xff]  ;;  %v194_v4 = vld [vmem:[#allocation7 + $0x58] sm:$0xff] }
  0x46   :  { %v390_v2 = vpack.c.bf16 %v89_v62, %v87_v61  ;;  %v408_v5 = vpack.c.bf16 %v194_v4, %v193_v3  ;;  %v56_v6 = vld [vmem:[#allocation2] sm:$0xff]  ;;  %v195_v7 = vld [vmem:[#allocation7 + $0x60] sm:$0xff]  ;;  %v57_v10 = vld [vmem:[#allocation2 + $0x8] sm:$0xff] }
  0x47   :  { %375 = vmatpush1.bf16.msra.mxu0 %v374_v28  ;;  %v196_v8 = vld [vmem:[#allocation7 + $0x68] sm:$0xff]  ;;  %v58_v11 = vld [vmem:[#allocation2 + $0x10] sm:$0xff]  ;;  %v197_v12 = vld [vmem:[#allocation7 + $0x70] sm:$0xff] }
  0x48   :  { %377 = vmatprep.subr.bf16.mxu0 %v376_v32  ;;  %400 = vmatpush3.bf16.msra.mxu1 %v399_v47  ;;  %v411_v9 = vpack.c.bf16 %v196_v8, %v195_v7  ;;  %v198_v13 = vld [vmem:[#allocation7 + $0x78] sm:$0xff] }
  0x49   :  { %401 = vmatprep.subr.bf16.mxu1 %v529_v1  ;;  %v414_v14 = vpack.c.bf16 %v198_v13, %v197_v12 }
  0x4b   :  { %379 = vmatpush1.bf16.msra.mxu0 %v378_v39 }
  0x4c   :  { %381 = vmatprep.subr.bf16.mxu0 %v380_v42  ;;  %403 = vmatpush3.bf16.msra.mxu1 %v402_v56 }
  0x4d   :  { %404 = vmatprep.subr.bf16.mxu1 %v529_v1 }
  0x4f   :  { %383 = vmatpush1.bf16.msra.mxu0 %v382_v48 }
  0x50   :  { %385 = vmatprep.subr.bf16.mxu0 %v384_v51  ;;  %406 = vmatpush3.bf16.msra.mxu1 %v405_v63 }
  0x51   :  { %407 = vmatprep.subr.bf16.mxu1 %v529_v1 }
  0x53   :  { %387 = vmatpush1.bf16.msra.mxu0 %v386_v57 }
  0x54   :  { %389 = vmatprep.subr.bf16.mxu0 %v388_v60  ;;  %409 = vmatpush3.bf16.msra.mxu1 %v408_v5 }
  0x55   :  { %410 = vmatprep.subr.bf16.mxu1 %v529_v1 }
  0x57   :  { %391 = vmatpush1.bf16.msra.mxu0 %v390_v2 }
  0x58   :  { %412 = vmatpush3.bf16.msra.mxu1 %v411_v9 }
  0x59   :  { %413 = vmatprep.subr.bf16.mxu1 %v529_v1 }
  0x5a   :  { %156 = vmatmul.mubr.f32.vlgmr.msra.gmra.mrb[0].mxu0 %v56_v6 }
  0x5b   :  { %161 = vmatprep.mubr.f32.mxu0 %v528_v0 }
  0x5c   :  { %415 = vmatpush3.bf16.msra.mxu1 %v414_v14 }
  0x5e   :  { %162 = vmatmul.mubr.f32.gmra.mrb[2].mxu0 %v57_v10 }
  0x5f   :  { %167 = vmatprep.mubr.f32.mxu0 %v528_v0 }
  0x62   :  { %168 = vmatmul.mubr.f32.gmra.mrb[4].mxu0 %v58_v11 }
 0x12d   :  { %v157_v15 = vpop.f32.mrb[0].mxu0 }
 0x12e   :  { %v174_v16 = vmul.f32 %v157_v15, %v157_v15  ;;  %v159_v17 = vpop.f32.mrb[1].mxu0 }
 0x12f   :  { %v177_v18 = vmul.f32 %v159_v17, %v159_v17 }
 0x131   :  { %v180_v19 = vadd.f32 %v177_v18, %v174_v16  ;;  %v163_v20 = vpop.f32.mrb[2].mxu0 }
 0x132   :  { %v175_v21 = vmul.f32 %v163_v20, %v163_v20  ;;  %v165_v22 = vpop.f32.mrb[3].mxu0 }
 0x133   :  { %v178_v23 = vmul.f32 %v165_v22, %v165_v22  ;;  %352 = vmatmul.mubr.f32.vlgmr.msra.gmra.mrb[0].mxu1 %v180_v19 }
 0x134   :  { %354 = vmatprep.mubr.msk.f32.mxu1 %vm530_vm0, %v528_v0 }
 0x135   :  { %v181_v1 = vadd.f32 %v178_v23, %v175_v21  ;;  %v169_v24 = vpop.f32.mrb[4].mxu0 }
 0x136   :  { %v176_v25 = vmul.f32 %v169_v24, %v169_v24  ;;  %v171_v26 = vpop.f32.mrb[5].mxu0 }
 0x137   :  { %v179_v27 = vmul.f32 %v171_v26, %v171_v26  ;;  %355 = vmatmul.mubr.f32.gmra.mrb[2].mxu1 %v181_v1 }
 0x138   :  { %357 = vmatprep.mubr.msk.f32.mxu1 %vm530_vm0, %v528_v0 }
 0x139   :  { %v182_v28 = vadd.f32 %v179_v27, %v176_v25 }
 0x13b   :  { %358 = vmatmul.mubr.f32.gmra.mrb[4].mxu1 %v182_v28 }
 0x206   :  { %v265_v29 = vpop.f32.mrb[0].mxu1 }
 0x207   :  { %279 = vst [vmem:[#allocation8] sm:$0xff] %v265_v29  ;;  %v353_v30 = vpop.f32.mrb[1].mxu1 }
 0x20a   :  { %v270_v31 = vpop.f32.mrb[2].mxu1 }
 0x20b   :  { %280 = vst [vmem:[#allocation8 + $0x8] sm:$0xff] %v270_v31  ;;  %v356_v32 = vpop.f32.mrb[3].mxu1 }
 0x20e   :  { %v275_v33 = vpop.f32.mrb[4].mxu1 }
 0x20f   :  { %281 = vst [vmem:[#allocation8 + $0x10] sm:$0xff] %v275_v33  ;;  %v359_v34 = vpop.f32.mrb[5].mxu1 }
 0x210   :  { %504 = shalt.err (!%p501_p0)
}
 0x211   :  { %s505_s27 = scalar_lea.hbm %s629_s3, 384 }
 0x212   :  { %p506_p1 = scmp.ne.s32.totalorder %s629_s3, %s505_s27  ;;  %p509_p2 = scmp.lt.u32.totalorder %s505_s27, %s629_s3 }
 0x214   :  { %p511_p3 = pnand %p509_p2, %p506_p1 }
 0x216   :  { %514 = shalt.err (!%p511_p3)
}
 0x217   :  { %293 = dma.vmem_to_hbm [thread:$0]  %s288_s23, 384, %s629_s3, [#allocation4], %s525_s1, %s525_s1, %s526_s9  }
 0x218   :  { %519 = dma.done.wait [#allocation4], 384  }
 0x219   :  { %520 = vsyncadd [#allocation4], 4294966912 }
 0x21a   :  { %297 = vsyncpa [#allocation3], 1 }
 0x21b   :  { %298 = vsyncpa [#allocation6], 1 }
 0x21c   :  { %299 = vsyncpa [#allocation4], 1 }

</bundles_post_ra>
